<compile_context>
chip_gen: v7x
topology: tpu7x:2x2x1
jax: 0.10.0
libtpu: 0.0.40
codegen_flags: <defaults>
</compile_context>

<pallas_src>
import jax
import jax.numpy as jnp
from jax.experimental import pallas as pl
from jax.experimental.pallas import tpu as pltpu


def _attention_pool_kernel(x_ref, w1_ref, b1_ref, w2_ref, out_ref):
    # x_ref:   (BB, T, D)  block of batch rows
    # w1_ref:  (D, H), b1_ref: (1, H), w2_ref: (1, H)  (row layout, VPU reduce)
    # out_ref: (BB, D)
    x = x_ref[...]                                   # (BB, T, D), input dtype
    BB, T, D = x.shape
    H = w1_ref.shape[1]

    # ---- hidden = tanh(x @ W1 + b1) --------------------------------------
    # Collapse (BB, T) into one large M so the MXU sees a single big matmul
    # (M = BB*T) instead of BB small ones.  f32 accumulation always.
    x2d = x.reshape(BB * T, D)
    h = jnp.tanh(
        jnp.dot(x2d, w1_ref[...], preferred_element_type=jnp.float32)
        + b1_ref[...]                                # (1, H) broadcasts
    ).reshape(BB, T, H)                              # f32

    # ---- scores: VPU mul + lane reduction (no N=1 MXU matmul, no b2) ------
    s = jnp.sum(h * w2_ref[0], axis=-1)              # (BB, T) f32, T on lanes

    # ---- softmax over time --------------------------------------------
    m = jnp.max(s, axis=-1, keepdims=True)           # (BB, 1)
    e = jnp.exp(s - m)                               # (BB, T)
    # Exact normalization: one divide on a (BB, 1) vector per block.  The
    # approximate vrcp (pl.reciprocal(approx=True)) was the source of the
    # previous >1e-3 mismatch.
    inv = 1.0 / jnp.sum(e, axis=-1, keepdims=True)   # (BB, 1) f32

    # ---- weighted sum over time, f32 accumulation -------------------------
    # Multiply in the input dtype (no second full-slab f32 copy of x) and
    # accumulate the time reduction in f32.
    prod = x * e[:, :, None].astype(x.dtype)         # (BB, T, D)
    acc = jnp.sum(prod, axis=1, dtype=jnp.float32)   # (BB, D) f32

    out_ref[...] = (acc * inv).astype(out_ref.dtype)


def _vmem_capacity_bytes():
    """Physical VMEM per TensorCore; 64 MiB (v7x-safe) fallback."""
    try:
        cap = int(pltpu.get_tpu_info().vmem_capacity_bytes)
        if cap > 0:
            return cap
    except Exception:
        pass
    return 64 * 1024 * 1024


def _choose_block_b(B, T, D, H, itemsize, vmem_cap):
    """Pick the batch block from the VMEM budget (not hardcoded)."""
    if B <= 8:
        return B
    # Live bytes per batch row per grid step:
    per_row = (
        2 * (T * D + D) * itemsize        # double-buffered x + out blocks
        + (T * H + 2 * T + T * D + D) * 4  # f32 temps: h, scores/exp, prod, acc
    )
    fixed = 2 * (D * H + 2 * H) * 4       # weight blocks (also double-buffered)
    budget = max(int(vmem_cap * 0.6) - fixed, 8 * per_row)
    bb = budget // per_row
    bb = max(bb, pl.cdiv(256, T))         # collapsed M = bb*T >= 256 for the MXU
    bb = min(bb, pl.cdiv(B, 2))           # keep >= 2 grid steps (pipeline/megacore)
    bb = max(8, (bb // 8) * 8)            # sublane-dense output stores
    return int(min(bb, B))


def attention_pooling(x, w1, b1, w2, b2=None, *, block_b=None, interpret=False):
    """x: (B, T, D) -> (B, D).  Matches AttentionPooling.forward.

    b2 (bias of the final Linear(H, 1)) is accepted for API parity but unused:
    softmax is shift-invariant, so a constant added to every score cancels.
    For best TPU throughput pass x and w1 as bf16 (softmax / accumulation stay
    in f32 inside the kernel).
    """
    del b2
    B, T, D = x.shape
    H = w1.shape[1]
    itemsize = jnp.dtype(x.dtype).itemsize

    vmem_cap = _vmem_capacity_bytes()
    if block_b is None:
        block_b = _choose_block_b(B, T, D, H, itemsize, vmem_cap)

    n_blocks = pl.cdiv(B, block_b)
    Bp = n_blocks * block_b
    if Bp != B:
        x = jnp.pad(x, ((0, Bp - B), (0, 0), (0, 0)))  # zero rows sliced off below

    b1_row = b1.reshape(1, H)
    w2_row = w2.reshape(1, H)        # row layout: consumed by a VPU reduce

    # Pipeline-accurate VMEM accounting: every BlockSpec operand (including the
    # constant-index weight blocks) is double-buffered, plus per-step f32 temps.
    need = (
        2 * block_b * (T * D + D) * itemsize          # pipelined x / out blocks
        + 2 * (D * H + 2 * H) * 4                     # W1 / b1 / w2 blocks
        + block_b * (T * H + 2 * T + T * D + D) * 4   # f32 temps in the body
    )
    vmem_limit = int(min(need * 3 // 2, (vmem_cap * 7) // 8))
    vmem_limit = max(vmem_limit, 32 * 1024 * 1024)

    out = pl.pallas_call(
        _attention_pool_kernel,
        out_shape=jax.ShapeDtypeStruct((Bp, D), x.dtype),
        grid_spec=pltpu.PrefetchScalarGridSpec(
            num_scalar_prefetch=0,
            grid=(n_blocks,),
            in_specs=[
                pl.BlockSpec((block_b, T, D), lambda b: (b, 0, 0)),  # x slab
                pl.BlockSpec((D, H), lambda b: (0, 0)),              # W1
                pl.BlockSpec((1, H), lambda b: (0, 0)),              # b1
                pl.BlockSpec((1, H), lambda b: (0, 0)),              # w2 row
            ],
            out_specs=pl.BlockSpec((block_b, D), lambda b: (b, 0)),
        ),
        compiler_params=pltpu.CompilerParams(
            dimension_semantics=("parallel",),
            vmem_limit_bytes=vmem_limit,
        ),
        interpret=interpret,
    )(x, w1, b1_row, w2_row)
    return out[:B]


def reference(x, w1, b1, w2, b2):
    """Pure-JAX reference matching the PyTorch forward (including b2).

    HIGHEST precision so the f32 reference is accurate ground truth (XLA's
    default f32 dot on TPU is a single bf16 MXU pass).
    """
    hp = jax.lax.Precision.HIGHEST
    h = jnp.tanh(jnp.dot(x, w1, precision=hp) + b1)   # (B, T, H)
    s = jnp.dot(h, w2, precision=hp) + b2             # (B, T, 1)
    w = jax.nn.softmax(s, axis=1)                     # softmax over time
    return jnp.sum(x * w, axis=1)                     # (B, D)


if __name__ == "__main__":
    key = jax.random.PRNGKey(0)
    # Small, lane/sublane-friendly shapes: D = H = 128; B > block_b so the grid
    # has multiple (parallel) steps and the pipeline actually double-buffers.
    B, T, D = 16, 16, 128
    H = D  # hidden_dims defaults to [input_dim]

    kx, kw1, kb1, kw2, kb2 = jax.random.split(key, 5)
    x = jax.random.normal(kx, (B, T, D), dtype=jnp.float32)
    lim1 = 1.0 / jnp.sqrt(D)
    w1 = jax.random.uniform(kw1, (D, H), minval=-lim1, maxval=lim1, dtype=jnp.float32)
    b1 = jax.random.uniform(kb1, (H,), minval=-lim1, maxval=lim1, dtype=jnp.float32)
    lim2 = 1.0 / jnp.sqrt(H)
    w2 = jax.random.uniform(kw2, (H, 1), minval=-lim2, maxval=lim2, dtype=jnp.float32)
    b2 = jax.random.uniform(kb2, (1,), minval=-lim2, maxval=lim2, dtype=jnp.float32)

    out = attention_pooling(x, w1, b1, w2, b2)
    jax.block_until_ready(out)

    ref = reference(x, w1, b1, w2, b2)
    assert out.shape == (B, D)
    # 2e-3 tolerance: covers the small difference between the Mosaic in-kernel
    # f32 matmul and the HIGHEST-precision XLA reference matmul (and the
    # reordered time reduction).  Semantic errors would be >= 1e-1.
    err = float(jnp.max(jnp.abs(out - ref)))
    assert jnp.allclose(out, ref, atol=2e-3, rtol=2e-3), f"mismatch vs reference: {err}"

    print("KERNEL_OK")
</pallas_src>

<mosaic_0001>
module attributes {stable_mosaic.version = 11 : i64} {
  func.func @_attention_pool_kernel(%arg0: i32, %arg1: memref<8x16x128xf32, #tpu.memory_space<vmem>>, %arg2: memref<128x128xf32, #tpu.memory_space<vmem>>, %arg3: memref<1x128xf32, #tpu.memory_space<vmem>>, %arg4: memref<1x128xf32, #tpu.memory_space<vmem>>, %arg5: memref<8x128xf32, #tpu.memory_space<vmem>>) attributes {dimension_semantics = [#tpu.dimension_semantics<parallel>], iteration_bounds = array<i64: 2>, scalar_prefetch = 0 : i64, scratch_operands = 0 : i64, tpu.core_type = #tpu.core_type<tc>, window_params = [{transform_indices = @transform_0, window_bounds = array<i64: 8, 16, 128>}, {pipeline_mode = #tpu.pipeline_mode<synchronous>, transform_indices = @transform_1, window_bounds = array<i64: 128, 128>}, {pipeline_mode = #tpu.pipeline_mode<synchronous>, transform_indices = @transform_2, window_bounds = array<i64: 1, 128>}, {pipeline_mode = #tpu.pipeline_mode<synchronous>, transform_indices = @transform_3, window_bounds = array<i64: 1, 128>}, {transform_indices = @transform_4, window_bounds = array<i64: 8, 128>}]} {
    %c0 = arith.constant 0 : index
    %c0_0 = arith.constant 0 : index
    %c0_1 = arith.constant 0 : index
    %0 = vector.load %arg1[%c0, %c0_0, %c0_1] : memref<8x16x128xf32, #tpu.memory_space<vmem>>, vector<8x16x128xf32>
    %1 = vector.shape_cast %0 : vector<8x16x128xf32> to vector<128x128xf32>
    %c0_2 = arith.constant 0 : index
    %c0_3 = arith.constant 0 : index
    %2 = vector.load %arg2[%c0_2, %c0_3] : memref<128x128xf32, #tpu.memory_space<vmem>>, vector<128x128xf32>
    %cst = arith.constant dense<0.000000e+00> : vector<128x128xf32>
    %3 = tpu.matmul %1, %2, %cst {dimension_numbers = #tpu.dot_dimension_numbers<[1], [0], [0], [1], [0, 0, 1, 1], [], []>} : vector<128x128xf32>, vector<128x128xf32>, vector<128x128xf32> -> vector<128x128xf32>
    %c0_4 = arith.constant 0 : index
    %c0_5 = arith.constant 0 : index
    %4 = vector.load %arg3[%c0_4, %c0_5] : memref<1x128xf32, #tpu.memory_space<vmem>>, vector<1x128xf32>
    %5 = vector.broadcast %4 : vector<1x128xf32> to vector<128x128xf32>
    %6 = arith.addf %3, %5 : vector<128x128xf32>
    %7 = math.tanh %6 : vector<128x128xf32>
    %8 = vector.shape_cast %7 : vector<128x128xf32> to vector<8x16x128xf32>
    %c0_6 = arith.constant 0 : index
    %c0_7 = arith.constant 0 : index
    %9 = vector.load %arg4[%c0_6, %c0_7] : memref<1x128xf32, #tpu.memory_space<vmem>>, vector<1x128xf32>
    %10 = vector.shape_cast %9 : vector<1x128xf32> to vector<128xf32>
    %11 = vector.shape_cast %10 : vector<128xf32> to vector<1x1x128xf32>
    %12 = vector.broadcast %11 : vector<1x1x128xf32> to vector<8x16x128xf32>
    %13 = arith.mulf %8, %12 : vector<8x16x128xf32>
    %cst_8 = arith.constant dense<0.000000e+00> : vector<8x16xf32>
    %14 = vector.multi_reduction <add>, %13, %cst_8 [2] : vector<8x16x128xf32> to vector<8x16xf32>
    %cst_9 = arith.constant dense<0xFF800000> : vector<8xf32>
    %15 = vector.multi_reduction <maximumf>, %14, %cst_9 [1] : vector<8x16xf32> to vector<8xf32>
    %16 = vector.shape_cast %15 : vector<8xf32> to vector<8x1xf32>
    %17 = vector.broadcast %16 : vector<8x1xf32> to vector<8x16xf32>
    %18 = arith.subf %14, %17 : vector<8x16xf32>
    %19 = math.exp %18 : vector<8x16xf32>
    %cst_10 = arith.constant dense<0.000000e+00> : vector<8xf32>
    %20 = vector.multi_reduction <add>, %19, %cst_10 [1] : vector<8x16xf32> to vector<8xf32>
    %21 = vector.shape_cast %20 : vector<8xf32> to vector<8x1xf32>
    %cst_11 = arith.constant 1.000000e+00 : f32
    %22 = vector.broadcast %cst_11 : f32 to vector<8x1xf32>
    %23 = arith.divf %22, %21 : vector<8x1xf32>
    %24 = vector.shape_cast %19 : vector<8x16xf32> to vector<8x16x1xf32>
    %25 = vector.broadcast %24 : vector<8x16x1xf32> to vector<8x16x128xf32>
    %26 = arith.mulf %0, %25 : vector<8x16x128xf32>
    %cst_12 = arith.constant dense<0.000000e+00> : vector<8x128xf32>
    %27 = vector.multi_reduction <add>, %26, %cst_12 [1] : vector<8x16x128xf32> to vector<8x128xf32>
    %28 = vector.broadcast %23 : vector<8x1xf32> to vector<8x128xf32>
    %29 = arith.mulf %27, %28 : vector<8x128xf32>
    %c0_13 = arith.constant 0 : index
    %c0_14 = arith.constant 0 : index
    %30 = vector.load %arg5[%c0_13, %c0_14] : memref<8x128xf32, #tpu.memory_space<vmem>>, vector<8x128xf32>
    tpu.vector_store %arg5[%c0_13, %c0_14], %29 {strides = array<i32>} : memref<8x128xf32, #tpu.memory_space<vmem>>, vector<8x128xf32>,
    return
  }
  func.func @transform_0(%arg0: i32) -> (i32, i32, i32) {
    %c0_i32 = arith.constant 0 : i32
    %c0_i32_0 = arith.constant 0 : i32
    %c0_i32_1 = arith.constant 0 : i32
    return %arg0, %c0_i32, %c0_i32_0 : i32, i32, i32
  }
  func.func @transform_1(%arg0: i32) -> (i32, i32) {
    %c0_i32 = arith.constant 0 : i32
    %c0_i32_0 = arith.constant 0 : i32
    %c0_i32_1 = arith.constant 0 : i32
    return %c0_i32, %c0_i32_0 : i32, i32
  }
  func.func @transform_2(%arg0: i32) -> (i32, i32) {
    %c0_i32 = arith.constant 0 : i32
    %c0_i32_0 = arith.constant 0 : i32
    %c0_i32_1 = arith.constant 0 : i32
    return %c0_i32, %c0_i32_0 : i32, i32
  }
  func.func @transform_3(%arg0: i32) -> (i32, i32) {
    %c0_i32 = arith.constant 0 : i32
    %c0_i32_0 = arith.constant 0 : i32
    %c0_i32_1 = arith.constant 0 : i32
    return %c0_i32, %c0_i32_0 : i32, i32
  }
  func.func @transform_4(%arg0: i32) -> (i32, i32) {
    %c0_i32 = arith.constant 0 : i32
    %c0_i32_0 = arith.constant 0 : i32
    return %arg0, %c0_i32 : i32, i32
  }
}

</mosaic_0001>

<bundles_post_ra>
// kernel: tpu_custom_call.1
= control target key start
LH: loop header
LB: loop body
LE: loop exit
PB: predicated region body
PF: predicated region fallthrough
CT: control target
= control target key end

     0   :  { %9 = vsyncpa [#allocation3], 0  ;;  %s2017_s0 = inlined_call_operand.hbm [shape: f32[16,16,128], index: 0, kind: input, shape index: {}]   ;;  %s2018_s1 = inlined_call_operand.hbm [shape: f32[128,128], index: 1, kind: input, shape index: {}]   ;;  %s2019_s2 = inlined_call_operand.vmem [shape: f32[1,128], index: 2, kind: input, shape index: {}]   ;;  %s2020_s3 = inlined_call_operand.vmem [shape: f32[1,128], index: 3, kind: input, shape index: {}]   ;;  %s2021_s4 = inlined_call_operand.hbm [shape: f32[16,128], index: 4, kind: output, shape index: {}]  }
   0x1   :  { %11 = vsyncpa [#allocation3 + $0x1], 0 }
   0x2   :  { %12 = vsyncpa [#allocation6], 0 }
   0x3   :  { %13 = vsyncpa [#allocation4], 0 }
   0x4   :  { %15 = vsyncpa [#allocation4 + $0x1], 0  ;;  %s1512_s15 = smov 0   ;;  %s1514_s16 = smov 0  }
   0x5   :  { %s1516_s17 = smov 0   ;;  %s1518_s18 = smov 0  }
   0x6 LB: > { %s1533_s19 = sadd.s32 4294967295, %s1479_s18   ;;  %s1067_s20 = sadd.s32 4294967294, %s1479_s18   ;;  %s1479_s18 = sphi %s1518_s18, %s2041_s18   ;;  %s1475_s17 = sphi %s1516_s17, %s2040_s17   ;;  %s1471_s16 = sphi %s1514_s16, %s2039_s16   ;;  %s1467_s15 = sphi %s1512_s15, %s2038_s15  }
   0x7   : > { %p41_p0 = scmp.ne.s32.totalorder %s1471_s16, %s1467_s15  ;;  %p2022_p1 = scmp.eq.s32.totalorder %s1533_s19, 0 }
   0x8   : > { %p134_p3 = scmp.eq.s32.totalorder %s1067_s20, 1  ;;  %p1068_p5 = scmp.ge.s32.totalorder %s1479_s18, 1 }
   0x9   : > { %p1542_p4 = por %p2022_p1, %p41_p0  ;;  %p141_p7 = scmp.lt.s32.totalorder %s1479_s18, 3 }
   0xa   : > { %p1547_p6 = por %p134_p3, %p41_p0  ;;  %s1481_s24 = smov [#allocation5]  }
   0xb   : > { %s2025_s21 = scalar_select %p1542_p4, 1, 0 }
   0xc   : > { %s2026_s22 = scalar_select %p1547_p6, 1, 0 }
   0xd   : > { %p1552_p8 = pnand %p1068_p5, %p141_p7  ;;  %s153_s25 = sshll.u32 %s1481_s24, 4  ;;  %s1556_s25 = int_to_ptr.vmem [resolvable:$true] %s153_s25 }
   0xe   : > { %s1568_s27 = sadd.s32 1, %s1479_s18   ;;  %s28_s28 = sadd.s32 1, %s1475_s17 }
   0xf   : > { %s2027_s23 = scalar_select %p1552_p8, 1, 0 }
  0x10   : > { %p1231_p9 = pneg %p1552_p8  ;;  %s25_s29 = ssub.s32 %s1479_s18, %s1568_s27 }
  0x11   : > { %s1351_s6 = scalar_lea.hbm %s2018_s1, 2048 }
  0x12   : > { %p1563_p11 = pnand %p1231_p9, %p2022_p1  ;;  %p1352_p12 = scmp.ne.s32.totalorder %s2018_s1, %s1351_s6 }
  0x13   : > { %p1358_p5 = scmp.lt.u32.totalorder %s1351_s6, %s2018_s1 }
  0x14   : > { %p1353_p13 = pneg %p1563_p11 }
  0x16   : > { %p1354_p0 = pnand %p1353_p13, %p1352_p12 }
  0x18   : > { %p1355_p3 = pneg %p1354_p0 }
  0x1a   : > { %p1360_p7 = pnand %p1358_p5, %p1355_p3 }
  0x1c   : > { %1363 = shalt.err (!%p1360_p7)
}
  0x1d   : > { %s1364_s11 = scalar_lea.vmem %s1556_s25, 2048  ;;  %p1372_p2 = scmp.lt.s32.totalorder %s1556_s25, %s1556_s25 }
  0x1e   : > { %p1365_p9 = scmp.ne.s32.totalorder %s1556_s25, %s1364_s11  ;;  %p1373_p6 = scmp.lt.s32.totalorder %s1364_s11, %s1364_s11 }
  0x20   : > { %p1367_p10 = pnand %p1365_p9, %p1353_p13  ;;  %p1374_p4 = por %p1373_p6, %p1372_p2 }
  0x22   : > { %p1368_p1 = pneg %p1367_p10 }
  0x24   : > { %p1375_p8 = pnand %p1374_p4, %p1368_p1 }
  0x26   : > { %1378 = shalt.err (!%p1375_p8)
}
  0x27   : > { %s1482_s12 = smov 128   ;;  %s1483_s13 = smov 8  }
  0x28   : > { %1234 = dma.hbm_to_vmem [thread:$0]  (!%p1563_p11), %s2018_s1, 2048, %s1556_s25, [#allocation6], %s1482_s12, %s1482_s12, %s1483_s13  }
  0x29   : > { %p26_p1 = scmp.eq.s32.totalorder %s25_s29, 0  ;;  %p35_p2 = scmp.ne.s32.totalorder %s1475_s17, %s1471_s16 }
  0x2a   : > { %p36_p4 = scmp.eq.s32.totalorder %s1479_s18, 0  ;;  %p1244_p6 = scmp.lt.s32.totalorder %s1479_s18, 2 }
  0x2b   : > { %s1602_s24 = scalar_select %p26_p1, %s1475_s17, %s28_s28  }
  0x2c   : > { %p37_p8 = por %p36_p4, %p35_p2  ;;  %p2029_p10 = scmp.eq.s32.totalorder %s1533_s19, 1 }
  0x2d   : > { %s173_s26 = sand.u32 1, %s1475_s17   ;;  %s1086_s5 = sshll.u32 %s1479_s18, 11 }
  0x2e   : > { %p1606_p12 = por %p2029_p10, %p35_p2  ;;  %s1071_s6 = sshll.u32 %s173_s26, 7 }
  0x2f   : > { %s1615_s9 = scalar_lea.hbm %s2017_s0, %s1086_s5  ;;  %s177_s25 = scalar_lea.vmem [#allocation2], %s1071_s6 }
  0x30   : > { %s185_s28 = sshll.u32 %s177_s25, 4  ;;  %p1617_p11 = pnand %p1244_p6, %p37_p8  ;;  %s1621_s28 = int_to_ptr.vmem [resolvable:$true] %s185_s28 }
  0x31   : > { %s1623_s10 = scalar_lea.sflag [#allocation3], %s173_s26  ;;  %s1379_s11 = scalar_lea.hbm %s1615_s9, 2048 }
  0x32   : > { %p1380_p13 = scmp.ne.s32.totalorder %s1615_s9, %s1379_s11  ;;  %p1381_p0 = pneg %p1617_p11 }
  0x33   : > { %s1384_s5 = scalar_lea.hbm %s2017_s0, 4096  ;;  %p1385_p7 = scmp.lt.u32.totalorder %s1615_s9, %s2017_s0 }
  0x34   : > { %p1382_p3 = pnand %p1381_p0, %p1380_p13  ;;  %p1386_p9 = scmp.lt.u32.totalorder %s1384_s5, %s1379_s11 }
  0x35   : > { %p1388_p2 = scmp.lt.u32.totalorder %s1379_s11, %s1615_s9 }
  0x36   : > { %p1383_p5 = pneg %p1382_p3  ;;  %p1387_p1 = por %p1386_p9, %p1385_p7 }
  0x38   : > { %p1389_p4 = por %p1388_p2, %p1387_p1 }
  0x3a   : > { %p1390_p6 = pnand %p1389_p4, %p1383_p5 }
  0x3c   : > { %1393 = shalt.err (!%p1390_p6)
}
  0x3d   : > { %s1394_s26 = scalar_lea.vmem %s1621_s28, 2048  ;;  %s1484_s8 = smov [#allocation2]  }
  0x3e   : > { %p1395_p8 = scmp.ne.s32.totalorder %s1621_s28, %s1394_s26  ;;  %s1399_s25 = sshll.u32 %s1484_s8, 4  ;;  %s1400_s25 = int_to_ptr.vmem [resolvable:$false] %s1399_s25 }
  0x3f   : > { %s1401_s14 = scalar_lea.vmem %s1400_s25, 4096  ;;  %p1402_p3 = scmp.lt.s32.totalorder %s1621_s28, %s1400_s25 }
  0x40   : > { %p1397_p10 = pnand %p1395_p8, %p1381_p0  ;;  %p1403_p7 = scmp.lt.s32.totalorder %s1401_s14, %s1394_s26 }
  0x42   : > { %p1398_p13 = pneg %p1397_p10  ;;  %p1404_p9 = por %p1403_p7, %p1402_p3 }
  0x44   : > { %p1405_p1 = pnand %p1404_p9, %p1398_p13 }
  0x46   : > { %1408 = shalt.err (!%p1405_p1)
}
  0x47   : > { %1238 = dma.hbm_to_vmem [thread:$0]  (!%p1617_p11), %s1615_s9, 2048, %s1621_s28, %s1623_s10, %s1482_s12, %s1482_s12, %s1483_s13  }
  0x48   : > { %p2032_p0 = scmp.ne.s32.totalorder %s2027_s23, 0 }
  0x49   : > { %s1657_s11 = sand.u32 (!%p2032_p0), 1, %s1471_s16   ;;  %p2033_p5 = scmp.ne.s32.totalorder (!%p2032_p0), %s2025_s21, 0 }
  0x4a   : > { %197 = sbr.rel (%p2032_p0) target bundleno = 1039 (0x40f), region = 36  ;;  %s1076_s20 = sshll.u32 (!%p2032_p0), %s1657_s11, 7 }
  0x4b   : > { %s200_s5 = scalar_lea.sflag (!%p2032_p0), [#allocation3], %s1657_s11  ;;  %s1661_s6 = scalar_lea.vmem (!%p2032_p0), [#allocation2], %s1076_s20 }
  0x51   : > { %1454 = dma.done.wait (%p2033_p5), %s200_s5, 2048  }
  0x52   : > { %1456 = vsyncadd (%p2033_p5), %s200_s5, 4294965248  ;;  %p2034_p11 = scmp.eq.s32.totalorder %s1533_s19, 0 }
  0x54   : > { %1458 = dma.done.wait (%p2034_p11), [#allocation6], 2048   ;;  %p2035_p2 = pmov %p2034_p11 }
  0x55   : > { %v249_v0 = vld [vmem:[#allocation5] sm:$0xff]  ;;  %v250_v1 = vld [vmem:[#allocation5 + $0x8] sm:$0xff]  ;;  %v251_v2 = vld [vmem:[#allocation5 + $0x10] sm:$0xff]  ;;  %vm515_vm0 = vcmask 130112   ;;  %vm580_vm1 = vcmask 1041409   ;;  %vm582_vm2 = vcmask 1042434  }
  0x56   : > { %1460 = vsyncadd (%p2035_p2), [#allocation6], 4294965248  ;;  %v1175_v3 = vpack.c.bf16 %v250_v1, %v249_v0  ;;  %v252_v4 = vld [vmem:[#allocation5 + $0x18] sm:$0xff]  ;;  %v253_v6 = vld [vmem:[#allocation5 + $0x20] sm:$0xff]  ;;  %vm584_vm3 = vcmask 1043459   ;;  %vm586_vm4 = vcmask 1044484  }
  0x57   : > { %v1179_v5 = vpack.c.bf16 %v252_v4, %v251_v2  ;;  %v254_v7 = vld [vmem:[#allocation5 + $0x28] sm:$0xff]  ;;  %v1672_v9 = vld [vmem:[%s1661_s6] sm:$0xff]  ;;  %v255_v11 = vld [vmem:[#allocation5 + $0x30] sm:$0xff]  ;;  %vm588_vm5 = vcmask 1045509   ;;  %vm590_vm6 = vcmask 1046534   ;;  %vm592_vm7 = vcmask 1047559  }
  0x58   : > { %1176 = vmatprep.subr.bf16.mxu0 %v1175_v3  ;;  %1207 = vmatprep.subr.bf16.mxu1 %v1175_v3  ;;  %v1183_v8 = vpack.c.bf16 %v254_v7, %v253_v6  ;;  %v1675_v10 = vld [vmem:[%s1661_s6 + $0x40] sm:$0xff]  ;;  %v256_v12 = vld [vmem:[#allocation5 + $0x38] sm:$0xff]  ;;  %v258_v15 = vld [vmem:[#allocation5 + $0x48] sm:$0xff]  ;;  %vm595_vm8 = vcmask 130048   ;;  %s1078_s9 = sshll.u32 %s1657_s11, 3  ;;  %s1082_s28 = sshll.u32 %s1533_s19, 7 }
  0x59   : > { %1178 = vmatpush3.bf16.msra.mxu0 %v1175_v3  ;;  %1215 = vmatpush3.bf16.msra.mxu1 %v1175_v3  ;;  %v1187_v13 = vpack.c.bf16 %v256_v12, %v255_v11  ;;  %v257_v14 = vld [vmem:[#allocation5 + $0x40] sm:$0xff]  ;;  %v259_v17 = vld [vmem:[#allocation5 + $0x50] sm:$0xff]  ;;  %v260_v18 = vld [vmem:[#allocation5 + $0x58] sm:$0xff]  ;;  %s231_s29 = scalar_lea.vmem [#allocation7], %s1078_s9  ;;  %s1972_s8 = scalar_lea.hbm %s2021_s4, %s1082_s28 }
  0x5a   : > { %1180 = vmatprep.subr.bf16.mxu0 %v1179_v5  ;;  %1208 = vmatprep.subr.bf16.mxu1 %v1179_v5  ;;  %v1191_v16 = vpack.c.bf16 %v258_v15, %v257_v14  ;;  %v1195_v19 = vpack.c.bf16 %v260_v18, %v259_v17  ;;  %v261_v20 = vld [vmem:[#allocation5 + $0x60] sm:$0xff]  ;;  %v262_v21 = vld [vmem:[#allocation5 + $0x68] sm:$0xff]  ;;  %v263_v23 = vld [vmem:[#allocation5 + $0x70] sm:$0xff]  ;;  %s987_s10 = sshll.u32 %s231_s29, 4  ;;  %s974_s19 = scalar_lea.sflag [#allocation4], %s1657_s11  ;;  %s1974_s10 = int_to_ptr.vmem [resolvable:$true] %s987_s10 }
  0x5b   : > { %1151 = vmatprep.mubr.f32.mxu0 %v1672_v9  ;;  %1163 = vmatprep.mubr.f32.mxu1 %v1675_v10  ;;  %v1199_v22 = vpack.c.bf16 %v262_v21, %v261_v20  ;;  %v264_v24 = vld [vmem:[#allocation5 + $0x78] sm:$0xff]  ;;  %v1680_v26 = vld [vmem:[%s1661_s6 + $0x8] sm:$0xff]  ;;  %v1686_v28 = vld [vmem:[%s1661_s6 + $0x10] sm:$0xff]  ;;  %s1409_s25 = scalar_lea.vmem %s1974_s10, 128  ;;  %s1486_s14 = smov [#allocation7]  }
  0x5c   : > { %v1203_v25 = vpack.c.bf16 %v264_v24, %v263_v23  ;;  %v1683_v27 = vld [vmem:[%s1661_s6 + $0x48] sm:$0xff]  ;;  %v1689_v29 = vld [vmem:[%s1661_s6 + $0x50] sm:$0xff]  ;;  %v1695_v30 = vld [vmem:[%s1661_s6 + $0x18] sm:$0xff]  ;;  %p1410_p4 = scmp.ne.s32.totalorder %s1974_s10, %s1409_s25  ;;  %s1413_s20 = sshll.u32 %s1486_s14, 4  ;;  %s1414_s20 = int_to_ptr.vmem [resolvable:$false] %s1413_s20 }
  0x5d   : > { %1182 = vmatpush3.bf16.msra.mxu0 %v1179_v5  ;;  %1216 = vmatpush3.bf16.msra.mxu1 %v1179_v5  ;;  %v1699_v31 = vld [vmem:[%s1661_s6 + $0x58] sm:$0xff]  ;;  %v1702_v32 = vld [vmem:[%s1661_s6 + $0x20] sm:$0xff]  ;;  %v1711_v34 = vld [vmem:[%s1661_s6 + $0x28] sm:$0xff]  ;;  %s1415_s5 = scalar_lea.vmem %s1414_s20, 256  ;;  %p1416_p10 = scmp.lt.s32.totalorder %s1974_s10, %s1414_s20 }
  0x5e   : > { %1184 = vmatprep.subr.bf16.mxu0 %v1183_v8  ;;  %1209 = vmatprep.subr.bf16.mxu1 %v1183_v8  ;;  %v1705_v33 = vld [vmem:[%s1661_s6 + $0x60] sm:$0xff]  ;;  %v1715_v35 = vld [vmem:[%s1661_s6 + $0x68] sm:$0xff]  ;;  %v1718_v36 = vld [vmem:[%s1661_s6 + $0x30] sm:$0xff]  ;;  %p1411_p6 = pnand %p1410_p4, %p1606_p12  ;;  %p1417_p13 = scmp.lt.s32.totalorder %s1415_s5, %s1409_s25 }
  0x5f   : > { %v1721_v37 = vld [vmem:[%s1661_s6 + $0x70] sm:$0xff]  ;;  %v1727_v38 = vld [vmem:[%s1661_s6 + $0x38] sm:$0xff]  ;;  %v1738_v40 = vld [vmem:[%s2019_s2] ss:$0 sm:$0xff] }
  0x60   : > { %v1731_v39 = vld [vmem:[%s1661_s6 + $0x78] sm:$0xff]  ;;  %v1752_v62 = vld [vmem:[%s2020_s3] ss:$0 sm:$0xff]  ;;  %p1412_p8 = pneg %p1411_p6  ;;  %p1418_p3 = por %p1417_p13, %p1416_p10 }
  0x61   : > { %1186 = vmatpush3.bf16.msra.mxu0 %v1183_v8  ;;  %1217 = vmatpush3.bf16.msra.mxu1 %v1183_v8 }
  0x62   : > { %1188 = vmatprep.subr.bf16.mxu0 %v1187_v13  ;;  %1210 = vmatprep.subr.bf16.mxu1 %v1187_v13  ;;  %p1419_p7 = pnand %p1418_p3, %p1412_p8 }
  0x65   : > { %1190 = vmatpush3.bf16.msra.mxu0 %v1187_v13  ;;  %1218 = vmatpush3.bf16.msra.mxu1 %v1187_v13 }
  0x66   : > { %1192 = vmatprep.subr.bf16.mxu0 %v1191_v16  ;;  %1211 = vmatprep.subr.bf16.mxu1 %v1191_v16 }
  0x69   : > { %1194 = vmatpush3.bf16.msra.mxu0 %v1191_v16  ;;  %1219 = vmatpush3.bf16.msra.mxu1 %v1191_v16 }
  0x6a   : > { %1196 = vmatprep.subr.bf16.mxu0 %v1195_v19  ;;  %1212 = vmatprep.subr.bf16.mxu1 %v1195_v19 }
  0x6d   : > { %1198 = vmatpush3.bf16.msra.mxu0 %v1195_v19  ;;  %1220 = vmatpush3.bf16.msra.mxu1 %v1195_v19 }
  0x6e   : > { %1200 = vmatprep.subr.bf16.mxu0 %v1199_v22  ;;  %1213 = vmatprep.subr.bf16.mxu1 %v1199_v22 }
  0x71   : > { %1202 = vmatpush3.bf16.msra.mxu0 %v1199_v22  ;;  %1221 = vmatpush3.bf16.msra.mxu1 %v1199_v22 }
  0x72   : > { %1204 = vmatprep.subr.bf16.mxu0 %v1203_v25  ;;  %1214 = vmatprep.subr.bf16.mxu1 %v1203_v25 }
  0x75   : > { %1206 = vmatpush3.bf16.msra.mxu0 %v1203_v25  ;;  %1222 = vmatpush3.bf16.msra.mxu1 %v1203_v25 }
  0x78   : > { %1152 = vmatmul.mubr.f32.vlgmr.msra.gmra.mrb[0].mxu0 %v1680_v26  ;;  %1164 = vmatmul.mubr.f32.vlgmr.msra.gmra.mrb[0].mxu1 %v1683_v27 }
  0x79   : > { %1154 = vmatprep.mubr.f32.mxu0 %v1686_v28  ;;  %1166 = vmatprep.mubr.f32.mxu1 %v1689_v29 }
  0x7c   : > { %1155 = vmatmul.mubr.f32.gmra.mrb[2].mxu0 %v1695_v30  ;;  %1167 = vmatmul.mubr.f32.gmra.mrb[2].mxu1 %v1699_v31 }
  0x7d   : > { %1157 = vmatprep.mubr.f32.mxu0 %v1702_v32  ;;  %1169 = vmatprep.mubr.f32.mxu1 %v1705_v33 }
  0x80   : > { %1158 = vmatmul.mubr.f32.gmra.mrb[4].mxu0 %v1711_v34  ;;  %1170 = vmatmul.mubr.f32.gmra.mrb[4].mxu1 %v1715_v35 }
  0x81   : > { %1160 = vmatprep.mubr.f32.mxu0 %v1718_v36  ;;  %1172 = vmatprep.mubr.f32.mxu1 %v1721_v37 }
  0x84   : > { %1161 = vmatmul.mubr.f32.gmra.mrb[6].mxu0 %v1727_v38  ;;  %1173 = vmatmul.mubr.f32.gmra.mrb[6].mxu1 %v1731_v39 }
 0x14b   : > { %v1153_v41 = vpop.f32.mrb[0].mxu0  ;;  %v1165_v42 = vpop.f32.mrb[0].mxu1 }
 0x14c   : > { %v344_v43 = vadd.f32 %v1153_v41, %v1738_v40  ;;  %v384_v44 = vadd.f32 %v1165_v42, %v1738_v40  ;;  %v338_v45 = vpop.f32.mrb[1].mxu0  ;;  %v378_v46 = vpop.f32.mrb[1].mxu1 }
 0x14d   : > { %v339_v47 = vadd.f32 %v1738_v40, %v338_v45  ;;  %v379_v48 = vadd.f32 %v1738_v40, %v378_v46 }
 0x14e   : > { %1285 = vtanh.f32 %v344_v43 }
 0x14f   : > { %1287 = vtanh.f32 %v384_v44  ;;  %v1156_v49 = vpop.f32.mrb[2].mxu0  ;;  %v1168_v50 = vpop.f32.mrb[2].mxu1 }
 0x150   : > { %1289 = vtanh.f32 %v339_v47  ;;  %v354_v51 = vadd.f32 %v1156_v49, %v1738_v40  ;;  %v348_v52 = vpop.f32.mrb[3].mxu0  ;;  %v394_v53 = vadd.f32 %v1168_v50, %v1738_v40  ;;  %v388_v54 = vpop.f32.mrb[3].mxu1 }
 0x151   : > { %v389_v57 = vadd.f32 %v1738_v40, %v388_v54  ;;  %v349_v60 = vadd.f32 %v1738_v40, %v348_v52 }
 0x152   : > { %1291 = vtanh.f32 %v354_v51 }
 0x153   : > { %1293 = vtanh.f32 %v379_v48  ;;  %v1159_v55 = vpop.f32.mrb[4].mxu0  ;;  %v1171_v56 = vpop.f32.mrb[4].mxu1 }
 0x154   : > { %1295 = vtanh.f32 %v394_v53  ;;  %v358_v58 = vpop.f32.mrb[5].mxu0  ;;  %v398_v59 = vpop.f32.mrb[5].mxu1  ;;  %v364_v63 = vadd.f32 %v1159_v55, %v1738_v40  ;;  %v404_v12 = vadd.f32 %v1171_v56, %v1738_v40 }
 0x155   : > { %v359_v61 = vadd.f32 %v1738_v40, %v358_v58  ;;  %1297 = vtanh.f32 %v389_v57  ;;  %v399_v11 = vadd.f32 %v1738_v40, %v398_v59 }
 0x156   : > { %1299 = vtanh.f32 %v349_v60 }
 0x157   : > { %v1162_v0 = vpop.f32.mrb[6].mxu0  ;;  %v1174_v1 = vpop.f32.mrb[6].mxu1  ;;  %1301 = vtanh.f32 %v359_v61 }
 0x158   : > { %v1286_v2 = vpop.eup %1285  ;;  %v368_v3 = vpop.f32.mrb[7].mxu0  ;;  %1303 = vtanh.f32 %v364_v63  ;;  %v374_v19 = vadd.f32 %v1162_v0, %v1738_v40  ;;  %v414_v25 = vadd.f32 %v1174_v1, %v1738_v40  ;;  %v504_v63 = vlaneseq }
 0x159   : > { %v408_v4 = vpop.f32.mrb[7].mxu1  ;;  %v1288_v5 = vpop.eup %1287  ;;  %v441_v6 = vmul.f32 %v1286_v2, %v1752_v62  ;;  %1305 = vtanh.f32 %v399_v11  ;;  %v369_v18 = vadd.f32 %v1738_v40, %v368_v3 }
 0x15a   : > { %v1290_v7 = vpop.eup %1289  ;;  %v449_v8 = vmul.f32 %v1288_v5, %v1752_v62  ;;  %1307 = vtanh.f32 %v404_v12  ;;  %v409_v23 = vadd.f32 %v1738_v40, %v408_v4  ;;  %v505_v2 = vand.u32 127, %v504_v63 }
 0x15b   : > { %458 = vadd.xlane.f32.xlu0 %v441_v6  ;;  %v440_v16 = vmul.f32 %v1290_v7, %v1752_v62  ;;  %1309 = vtanh.f32 %v369_v18 }
 0x15c   : > { %v1292_v13 = vpop.eup %1291  ;;  %474 = vadd.xlane.f32.xlu1 %v449_v8  ;;  %1311 = vtanh.f32 %v374_v19  ;;  %v510_v5 = vadd.s32 4294967288, %v505_v2 }
 0x15d   : > { %v1294_v14 = vpop.eup %1293  ;;  %v443_v15 = vmul.f32 %v1292_v13, %v1752_v62  ;;  %1313 = vtanh.f32 %v409_v23 }
 0x15e   : > { %v1296_v17 = vpop.eup %1295  ;;  %v448_v21 = vmul.f32 %v1294_v14, %v1752_v62  ;;  %1315 = vtanh.f32 %v414_v25 }
 0x15f   : > { %456 = vadd.xlane.f32.xlu0 %v440_v16  ;;  %v451_v20 = vmul.f32 %v1296_v17, %v1752_v62  ;;  %v1298_v22 = vpop.eup %1297 }
 0x160   : > { %462 = vadd.xlane.f32.xlu1 %v443_v15  ;;  %v1300_v24 = vpop.eup %1299  ;;  %v450_v43 = vmul.f32 %v1298_v22, %v1752_v62 }
 0x161   : > { %v1302_v41 = vpop.eup %1301  ;;  %v442_v44 = vmul.f32 %v1300_v24, %v1752_v62 }
 0x162   : > { %v1304_v42 = vpop.eup %1303  ;;  %v444_v45 = vmul.f32 %v1302_v41, %v1752_v62 }
 0x163   : > { %472 = vadd.xlane.f32.xlu0 %v448_v21  ;;  %v1306_v46 = vpop.eup %1305  ;;  %v445_v47 = vmul.f32 %v1304_v42, %v1752_v62 }
 0x164   : > { %478 = vadd.xlane.f32.xlu1 %v451_v20  ;;  %v1308_v48 = vpop.eup %1307  ;;  %v452_v40 = vmul.f32 %v1306_v46, %v1752_v62 }
 0x165   : > { %v1310_v49 = vpop.eup %1309  ;;  %v453_v50 = vmul.f32 %v1308_v48, %v1752_v62 }
 0x166   : > { %v1312_v51 = vpop.eup %1311  ;;  %v446_v52 = vmul.f32 %v1310_v49, %v1752_v62 }
 0x167   : > { %476 = vadd.xlane.f32.xlu0 %v450_v43  ;;  %v1314_v53 = vpop.eup %1313  ;;  %v447_v54 = vmul.f32 %v1312_v51, %v1752_v62 }
 0x168   : > { %460 = vadd.xlane.f32.xlu1 %v442_v44  ;;  %v1316_v55 = vpop.eup %1315  ;;  %v454_v56 = vmul.f32 %v1314_v53, %v1752_v62 }
 0x169   : > { %v455_v57 = vmul.f32 %v1316_v55, %v1752_v62  ;;  %v1793_v62 = vshrl.u32 %v504_v63, 7 }
 0x16b   : > { %464 = vadd.xlane.f32.xlu0 %v444_v45  ;;  %v1800_v8 = vsub.s32 %v505_v2, %v1793_v62  ;;  %v1803_v11 = vsub.s32 %v510_v5, %v1793_v62 }
 0x16c   : > { %466 = vadd.xlane.f32.xlu1 %v445_v47 }
 0x16f   : > { %480 = vadd.xlane.f32.xlu0 %v452_v40 }
 0x170   : > { %482 = vadd.xlane.f32.xlu1 %v453_v50 }
 0x173   : > { %468 = vadd.xlane.f32.xlu0 %v446_v52 }
 0x174   : > { %470 = vadd.xlane.f32.xlu1 %v447_v54 }
 0x177   : > { %484 = vadd.xlane.f32.xlu0 %v454_v56 }
 0x178   : > { %486 = vadd.xlane.f32.xlu1 %v455_v57 }
 0x1e8   : > { %v1777_v58 = vpop.xlane.xlu0 %458 }
 0x1e9   : > { %v1779_v59 = vpop.xlane.xlu1 %474  ;;  %v514_v19 = vrot.slane %v1777_v58, %v1803_v11 }
 0x1ea   : > { %v551_v44 = vrot.slane %v1779_v59, %v1803_v11 }
 0x1ec   : > { %v1781_v60 = vpop.xlane.xlu0 %456 }
 0x1ed   : > { %v1783_v61 = vpop.xlane.xlu1 %462  ;;  %v509_v18 = vrot.slane %v1781_v60, %v1800_v8 }
 0x1ee   : > { %v524_v17 = vrot.slane %v1783_v61, %v1803_v11 }
 0x1ef   : > { %v516_v41 = vsel %vm515_vm0, %v514_v19, %v509_v18  ;;  %v602_v18 = vsub.s32 0, %v1793_v62  ;;  %v606_v19 = vsub.s32 1, %v1793_v62 }
 0x1f0   : > { %v1785_v0 = vpop.xlane.xlu0 %472 }
 0x1f1   : > { %v1787_v1 = vpop.xlane.xlu1 %478  ;;  %v547_v22 = vrot.slane %v1785_v0, %v1800_v8 }
 0x1f2   : > { %v560_v48 = vrot.slane %v1787_v1, %v1803_v11 }
 0x1f3   : > { %v552_v51 = vsel %vm515_vm0, %v551_v44, %v547_v22 }
 0x1f4   : > { %v1789_v3 = vpop.xlane.xlu0 %476 }
 0x1f5   : > { %v1791_v4 = vpop.xlane.xlu1 %460  ;;  %v556_v42 = vrot.slane %v1789_v3, %v1800_v8 }
 0x1f6   : > { %v520_v12 = vrot.slane %v1791_v4, %v1800_v8 }
 0x1f7   : > { %v561_v55 = vsel %vm515_vm0, %v560_v48, %v556_v42 }
 0x1f8   : > { %v1795_v6 = vpop.xlane.xlu0 %464  ;;  %v525_v20 = vsel %vm515_vm0, %v524_v17, %v520_v12  ;;  %v1485_v17 = vmov 0  }
 0x1f9   : > { %v1797_v7 = vpop.xlane.xlu1 %466  ;;  %v529_v15 = vrot.slane %v1795_v6, %v1800_v8  ;;  %v581_v45 = vsel %vm580_vm1, %v525_v20, %v516_v41  ;;  %1284 = vset.pattern.permute.xlu0 %v1485_v17  ;;  %1283 = vset.pattern.permute.xlu1 %v1485_v17 }
 0x1fa   : > { %v533_v14 = vrot.slane %v1797_v7, %v1803_v11 }
 0x1fc   : > { %v1807_v13 = vpop.xlane.xlu0 %480  ;;  %v534_v23 = vsel %vm515_vm0, %v533_v14, %v529_v15 }
 0x1fd   : > { %v1813_v16 = vpop.xlane.xlu1 %482  ;;  %v565_v47 = vrot.slane %v1807_v13, %v1800_v8  ;;  %v583_v40 = vsel %vm582_vm2, %v534_v23, %v581_v45  ;;  %v626_v45 = vsub.s32 6, %v1793_v62 }
 0x1fe   : > { %v569_v46 = vrot.slane %v1813_v16, %v1803_v11 }
 0x200   : > { %v1822_v21 = vpop.xlane.xlu0 %468  ;;  %v570_v63 = vsel %vm515_vm0, %v569_v46, %v565_v47 }
 0x201   : > { %v1827_v24 = vpop.xlane.xlu1 %470  ;;  %v538_v25 = vrot.slane %v1822_v21, %v1800_v8 }
 0x202   : > { %v542_v43 = vrot.slane %v1827_v24, %v1803_v11 }
 0x204   : > { %v543_v49 = vsel %vm515_vm0, %v542_v43, %v538_v25  ;;  %v1847_v50 = vpop.xlane.xlu0 %484  ;;  %v622_v25 = vsub.s32 5, %v1793_v62  ;;  %v610_v43 = vsub.s32 2, %v1793_v62 }
 0x205   : > { %v585_v52 = vsel %vm584_vm3, %v543_v49, %v583_v40  ;;  %v1851_v53 = vpop.xlane.xlu1 %486  ;;  %v574_v54 = vrot.slane %v1847_v50, %v1800_v8 }
 0x206   : > { %v578_v56 = vrot.slane %v1851_v53, %v1803_v11  ;;  %v587_v57 = vsel %vm586_vm4, %v552_v51, %v585_v52 }
 0x207   : > { %v589_v2 = vsel %vm588_vm5, %v561_v55, %v587_v57 }
 0x208   : > { %v579_v5 = vsel %vm515_vm0, %v578_v56, %v574_v54  ;;  %v591_v12 = vsel %vm590_vm6, %v570_v63, %v589_v2 }
 0x209   : > { %v593_v14 = vsel %vm592_vm7, %v579_v5, %v591_v12 }
 0x20a   : > { %v596_v15 = vsel %vm595_vm8, %v593_v14, -inf }
 0x20b   : > { %597 = vmax.xlane.f32.xlu0 %v596_v15 }
 0x298   : > { %v598_v20 = vpop.xlane.xlu0 %597 }
 0x299   : > { %v603_v22 = vrot.slane %v598_v20, %v602_v18  ;;  %v607_v23 = vrot.slane %v598_v20, %v606_v19  ;;  %v1873_v46 = vrot.slane %v598_v20, %v622_v25  ;;  %v611_v40 = vrot.slane %v598_v20, %v610_v43 }
 0x29a   : > { %v1877_v52 = vrot.slane %v598_v20, %v626_v45 }
 0x29b   : > { %v640_v41 = vsub.f32 %v1781_v60, %v603_v22  ;;  %v641_v42 = vsub.f32 %v1777_v58, %v603_v22  ;;  %v642_v44 = vsub.f32 %v1791_v4, %v607_v23  ;;  %v643_v49 = vsub.f32 %v1783_v61, %v607_v23 }
 0x29c   : > { %v630_v60 = vsub.s32 7, %v1793_v62  ;;  %v650_v58 = vsub.f32 %v1789_v3, %v1873_v46  ;;  %v614_v4 = vsub.s32 3, %v1793_v62  ;;  %v644_v54 = vsub.f32 %v1795_v6, %v611_v40 }
 0x29d   : > { %v656_v47 = vmul.f32 1.442695, %v640_v41  ;;  %v658_v48 = vmul.f32 1.442695, %v641_v42  ;;  %v660_v51 = vmul.f32 1.442695, %v642_v44  ;;  %v652_v61 = vsub.f32 %v1807_v13, %v1877_v52 }
 0x29e   : > { %v662_v55 = vmul.f32 1.442695, %v643_v49  ;;  %v631_v56 = vrot.slane %v598_v20, %v630_v60  ;;  %v676_v57 = vmul.f32 1.442695, %v650_v58  ;;  %v615_v63 = vrot.slane %v598_v20, %v614_v4 }
 0x29f   : > { %1317 = vpow2.f32 %v656_v47  ;;  %v645_v2 = vsub.f32 %v1797_v7, %v611_v40  ;;  %v664_v5 = vmul.f32 1.442695, %v644_v54  ;;  %v680_v3 = vmul.f32 1.442695, %v652_v61 }
 0x2a0   : > { %1319 = vpow2.f32 %v658_v48  ;;  %v654_v14 = vsub.f32 %v1847_v50, %v631_v56  ;;  %v618_v6 = vsub.s32 4, %v1793_v62  ;;  %v646_v17 = vsub.f32 %v1822_v21, %v615_v63 }
 0x2a1   : > { %1321 = vpow2.f32 %v660_v51  ;;  %v666_v18 = vmul.f32 1.442695, %v645_v2  ;;  %v647_v22 = vsub.f32 %v1827_v24, %v615_v63  ;;  %v651_v45 = vsub.f32 %v1787_v1, %v1873_v46 }
 0x2a2   : > { %1323 = vpow2.f32 %v662_v55  ;;  %v684_v19 = vmul.f32 1.442695, %v654_v14  ;;  %v619_v7 = vrot.slane %v598_v20, %v618_v6  ;;  %v668_v50 = vmul.f32 1.442695, %v646_v17 }
 0x2a3   : > { %1325 = vpow2.f32 %v676_v57  ;;  %v670_v21 = vmul.f32 1.442695, %v647_v22  ;;  %v653_v48 = vsub.f32 %v1813_v16, %v1877_v52  ;;  %v678_v40 = vmul.f32 1.442695, %v651_v45 }
 0x2a4   : > { %1327 = vpow2.f32 %v664_v5  ;;  %v648_v62 = vsub.f32 %v1785_v0, %v619_v7  ;;  %v649_v43 = vsub.f32 %v1779_v59, %v619_v7  ;;  %v655_v49 = vsub.f32 %v1851_v53, %v631_v56 }
 0x2a5   : > { %1329 = vpow2.f32 %v680_v3  ;;  %v682_v51 = vmul.f32 1.442695, %v653_v48 }
 0x2a6   : > { %1331 = vpow2.f32 %v666_v18  ;;  %v672_v20 = vmul.f32 1.442695, %v648_v62  ;;  %v674_v47 = vmul.f32 1.442695, %v649_v43  ;;  %v686_v1 = vmul.f32 1.442695, %v655_v49 }
 0x2a7   : > { %1333 = vpow2.f32 %v684_v19 }
 0x2a8   : > { %1335 = vpow2.f32 %v668_v50 }
 0x2a9   : > { %v1318_v12 = vpop.eup %1317  ;;  %1337 = vpow2.f32 %v670_v21 }
 0x2aa   : > { %v1320_v15 = vpop.eup %1319  ;;  %705 = vperm.xlu1 %1283, %v1318_v12   ;;  %1339 = vpow2.f32 %v672_v20 }
 0x2ab   : > { %708 = vperm.xlu0 %1284, %v1320_v15   ;;  %v1322_v13 = vpop.eup %1321  ;;  %1341 = vpow2.f32 %v674_v47 }
 0x2ac   : > { %v1324_v23 = vpop.eup %1323  ;;  %1343 = vpow2.f32 %v678_v40 }
 0x2ad   : > { %v1326_v25 = vpop.eup %1325  ;;  %1345 = vpow2.f32 %v682_v51 }
 0x2ae   : > { %711 = vperm.xlu1 %1283, %v1322_v13   ;;  %v1328_v41 = vpop.eup %1327  ;;  %1347 = vpow2.f32 %v686_v1 }
 0x2af   : > { %735 = vperm.xlu0 %1284, %v1326_v25   ;;  %v1330_v42 = vpop.eup %1329 }
 0x2b0   : > { %v1332_v24 = vpop.eup %1331 }
 0x2b1   : > { %v1334_v44 = vpop.eup %1333 }
 0x2b2   : > { %714 = vperm.xlu1 %1283, %v1324_v23   ;;  %v1336_v0 = vpop.eup %1335 }
 0x2b3   : > { %741 = vperm.xlu0 %1284, %v1330_v42   ;;  %v1338_v59 = vpop.eup %1337 }
 0x2b4   : > { %v1340_v60 = vpop.eup %1339 }
 0x2b5   : > { %v1342_v46 = vpop.eup %1341 }
 0x2b6   : > { %717 = vperm.xlu1 %1283, %v1328_v41   ;;  %v1344_v58 = vpop.eup %1343 }
 0x2b7   : > { %747 = vperm.xlu0 %1284, %v1334_v44   ;;  %v1346_v4 = vpop.eup %1345 }
 0x2b8   : > { %v1348_v16 = vpop.eup %1347 }
 0x2ba   : > { %720 = vperm.xlu1 %1283, %v1332_v24  }
 0x2be   : > { %723 = vperm.xlu1 %1283, %v1336_v0  }
 0x2c2   : > { %726 = vperm.xlu1 %1283, %v1338_v59  }
 0x2c6   : > { %729 = vperm.xlu1 %1283, %v1340_v60  }
 0x2ca   : > { %732 = vperm.xlu1 %1283, %v1342_v46  }
 0x2ce   : > { %738 = vperm.xlu1 %1283, %v1344_v58  }
 0x2d2   : > { %744 = vperm.xlu1 %1283, %v1346_v4  }
 0x2d6   : > { %750 = vperm.xlu1 %1283, %v1348_v16  }
 0x329   : > { %v706_v52 = vpop.permute.xlu1 %705 }
 0x32a   : > { %v709_v54 = vpop.permute.xlu0 %708  ;;  %v853_v55 = vmul.f32 %v706_v52, %v1672_v9  ;;  %v755_v23 = vrot.slane %v706_v52, %v1800_v8 }
 0x32b   : > { %v854_v53 = vmul.f32 %v709_v54, %v1680_v26  ;;  %v759_v50 = vrot.slane %v709_v54, %v1803_v11 }
 0x32d   : > { %v1899_v56 = vadd.f32 %v854_v53, %v853_v55  ;;  %v712_v61 = vpop.permute.xlu1 %711  ;;  %v760_v45 = vsel %vm515_vm0, %v759_v50, %v755_v23 }
 0x32e   : > { %v855_v63 = vmul.f32 %v712_v61, %v1686_v28  ;;  %v764_v21 = vrot.slane %v712_v61, %v1800_v8 }
 0x331   : > { %v715_v57 = vpop.permute.xlu1 %714 }
 0x332   : > { %v856_v2 = vmul.f32 %v715_v57, %v1695_v30  ;;  %v736_v30 = vpop.permute.xlu0 %735 }
 0x333   : > { %v863_v62 = vmul.f32 %v736_v30, %v1689_v29  ;;  %v800_v29 = vrot.slane %v736_v30, %v1800_v8 }
 0x334   : > { %v1903_v5 = vadd.f32 %v856_v2, %v855_v63 }
 0x335   : > { %v718_v12 = vpop.permute.xlu1 %717 }
 0x336   : > { %v857_v15 = vmul.f32 %v718_v12, %v1702_v32  ;;  %v742_v25 = vpop.permute.xlu0 %741 }
 0x337   : > { %v865_v48 = vmul.f32 %v742_v25, %v1705_v33  ;;  %v809_v51 = vrot.slane %v742_v25, %v1800_v8 }
 0x339   : > { %v721_v14 = vpop.permute.xlu1 %720 }
 0x33a   : > { %v858_v3 = vmul.f32 %v721_v14, %v1711_v34  ;;  %v768_v34 = vrot.slane %v715_v57, %v1803_v11  ;;  %v748_v1 = vpop.permute.xlu0 %747 }
 0x33b   : > { %v818_v55 = vrot.slane %v748_v1, %v1800_v8 }
 0x33c   : > { %v1907_v6 = vadd.f32 %v858_v3, %v857_v15  ;;  %v769_v43 = vsel %vm515_vm0, %v768_v34, %v764_v21  ;;  %v867_v3 = vmul.f32 %v748_v1, %v1721_v37 }
 0x33d   : > { %v724_v9 = vpop.permute.xlu1 %723  ;;  %v824_v60 = vsel %vm580_vm1, %v769_v43, %v760_v45 }
 0x33e   : > { %v859_v17 = vmul.f32 %v724_v9, %v1718_v36  ;;  %v777_v36 = vrot.slane %v721_v14, %v1803_v11  ;;  %v782_v20 = vrot.slane %v724_v9, %v1800_v8  ;;  %v884_v15 = vrot.slane %v1907_v6, 4 }
 0x341   : > { %v727_v26 = vpop.permute.xlu1 %726 }
 0x342   : > { %v860_v18 = vmul.f32 %v727_v26, %v1727_v38  ;;  %v786_v41 = vrot.slane %v727_v26, %v1803_v11 }
 0x344   : > { %v1911_v13 = vadd.f32 %v860_v18, %v859_v17  ;;  %v787_v40 = vsel %vm515_vm0, %v786_v41, %v782_v20 }
 0x345   : > { %v730_v28 = vpop.permute.xlu1 %729 }
 0x346   : > { %v861_v7 = vmul.f32 %v730_v28, %v1675_v10  ;;  %v791_v0 = vrot.slane %v730_v28, %v1800_v8  ;;  %v891_v9 = vrot.slane %v1911_v13, 4 }
 0x349   : > { %v733_v19 = vpop.permute.xlu1 %732 }
 0x34a   : > { %v862_v22 = vmul.f32 %v733_v19, %v1683_v27  ;;  %v773_v27 = vrot.slane %v718_v12, %v1800_v8  ;;  %v795_v42 = vrot.slane %v733_v19, %v1803_v11  ;;  %v870_v8 = vrot.slane %v1899_v56, 4 }
 0x34b   : > { %v885_v19 = vadd.f32 %v884_v15, %v1907_v6 }
 0x34c   : > { %v897_v32 = vadd.f32 %v862_v22, %v861_v7  ;;  %v778_v47 = vsel %vm515_vm0, %v777_v36, %v773_v27  ;;  %v796_v46 = vsel %vm515_vm0, %v795_v42, %v791_v0  ;;  %v871_v28 = vadd.f32 %v870_v8, %v1899_v56 }
 0x34d   : > { %v739_v38 = vpop.permute.xlu1 %738  ;;  %v825_v58 = vsel %vm582_vm2, %v778_v47, %v824_v60  ;;  %v886_v25 = vrot.slane %v885_v19, 2 }
 0x34e   : > { %v864_v10 = vmul.f32 %v739_v38, %v1699_v31  ;;  %v804_v24 = vrot.slane %v739_v38, %v1803_v11  ;;  %v826_v33 = vsel %vm584_vm3, %v787_v40, %v825_v58  ;;  %v898_v17 = vrot.slane %v897_v32, 4 }
 0x34f   : > { %v827_v53 = vsel %vm586_vm4, %v796_v46, %v826_v33  ;;  %v872_v50 = vrot.slane %v871_v28, 2  ;;  %v887_v27 = vadd.f32 %v886_v25, %v885_v19 }
 0x350   : > { %v904_v44 = vadd.f32 %v864_v10, %v863_v62  ;;  %v805_v4 = vsel %vm515_vm0, %v804_v24, %v800_v29  ;;  %v899_v22 = vadd.f32 %v898_v17, %v897_v32 }
 0x351   : > { %v745_v31 = vpop.permute.xlu1 %744  ;;  %v828_v61 = vsel %vm588_vm5, %v805_v4, %v827_v53  ;;  %v873_v56 = vadd.f32 %v872_v50, %v871_v28 }
 0x352   : > { %v813_v59 = vrot.slane %v745_v31, %v1803_v11  ;;  %v866_v49 = vmul.f32 %v745_v31, %v1715_v35  ;;  %v905_v18 = vrot.slane %v904_v44, 4  ;;  %v900_v41 = vrot.slane %v899_v22, 2 }
 0x353   : > { %v874_v32 = vrot.slane %v873_v56, 1 }
 0x354   : > { %v911_v16 = vadd.f32 %v866_v49, %v865_v48  ;;  %v814_v54 = vsel %vm515_vm0, %v813_v59, %v809_v51  ;;  %v906_v34 = vadd.f32 %v905_v18, %v904_v44  ;;  %v901_v43 = vadd.f32 %v900_v41, %v899_v22 }
 0x355   : > { %v751_v52 = vpop.permute.xlu1 %750  ;;  %v829_v63 = vsel %vm590_vm6, %v814_v54, %v828_v61  ;;  %v888_v44 = vrot.slane %v887_v27, 1  ;;  %v875_v48 = vadd.f32 %v874_v32, %v873_v56 }
 0x356   : > { %v822_v35 = vrot.slane %v751_v52, %v1803_v11  ;;  %v868_v14 = vmul.f32 %v751_v52, %v1731_v39  ;;  %v877_v11 = vrot.slane %v1903_v5, 4  ;;  %v892_v39 = vadd.f32 %v891_v9, %v1911_v13 }
 0x357   : > { %v912_v37 = vrot.slane %v911_v16, 4  ;;  %v907_v10 = vrot.slane %v906_v34, 2  ;;  %v902_v0 = vrot.slane %v901_v43, 1  ;;  %v889_v49 = vadd.f32 %v888_v44, %v887_v27 }
 0x358   : > { %v823_v57 = vsel %vm515_vm0, %v822_v35, %v818_v55  ;;  %v918_v26 = vadd.f32 %v868_v14, %v867_v3  ;;  %v878_v30 = vadd.f32 %v877_v11, %v1903_v5  ;;  %v893_v36 = vrot.slane %v892_v39, 2 }
 0x359   : > { %v830_v2 = vsel %vm592_vm7, %v823_v57, %v829_v63  ;;  %v913_v38 = vadd.f32 %v912_v37, %v911_v16  ;;  %v908_v20 = vadd.f32 %v907_v10, %v906_v34  ;;  %v903_v33 = vadd.f32 %v902_v0, %v901_v43 }
 0x35a   : > { %v832_v12 = vsel %vm595_vm8, %v830_v2, 0.0  ;;  %v919_v7 = vrot.slane %v918_v26, 4  ;;  %v879_v23 = vrot.slane %v878_v30, 2  ;;  %v894_v6 = vadd.f32 %v893_v36, %v892_v39 }
 0x35b   : > { %833 = vadd.xlane.f32.xlu0 %v832_v12  ;;  %v914_v42 = vrot.slane %v913_v38, 2  ;;  %v909_v31 = vrot.slane %v908_v20, 1 }
 0x35c   : > { %v920_v62 = vadd.f32 %v919_v7, %v918_v26  ;;  %v880_v5 = vadd.f32 %v879_v23, %v878_v30  ;;  %v895_v45 = vrot.slane %v894_v6, 1 }
 0x35d   : > { %v915_v29 = vadd.f32 %v914_v42, %v913_v38  ;;  %v910_v52 = vadd.f32 %v909_v31, %v908_v20 }
 0x35e   : > { %v921_v13 = vrot.slane %v920_v62, 2  ;;  %v881_v24 = vrot.slane %v880_v5, 1  ;;  %v896_v51 = vadd.f32 %v895_v45, %v894_v6 }
 0x35f   : > { %v916_v60 = vrot.slane %v915_v29, 1 }
 0x360   : > { %v922_v47 = vadd.f32 %v921_v13, %v920_v62  ;;  %v882_v40 = vadd.f32 %v881_v24, %v880_v5 }
 0x361   : > { %v917_v63 = vadd.f32 %v916_v60, %v915_v29 }
 0x362   : > { %v923_v1 = vrot.slane %v922_v47, 1 }
 0x364   : > { %v924_v2 = vadd.f32 %v923_v1, %v922_v47 }
 0x3e8   : > { %v834_v21 = vpop.xlane.xlu0 %833 }
 0x3e9   : > { %1349 = vrcp.f32 %v834_v21 }
 0x3f3   : > { %v1350_v59 = vpop.eup %1349 }
 0x3f4   : > { %v926_v46 = vrot.slane %v1350_v59, 1  ;;  %v927_v58 = vrot.slane %v1350_v59, 2  ;;  %v928_v4 = vrot.slane %v1350_v59, 3  ;;  %v929_v16 = vrot.slane %v1350_v59, 4 }
 0x3f5   : > { %v930_v54 = vrot.slane %v1350_v59, 5  ;;  %v931_v55 = vrot.slane %v1350_v59, 6  ;;  %v932_v35 = vrot.slane %v1350_v59, 7  ;;  %v941_v14 = vmul.f32 %v1350_v59, %v875_v48 }
 0x3f6   : > { %v942_v53 = vmul.f32 %v926_v46, %v882_v40  ;;  %v943_v61 = vmul.f32 %v927_v58, %v889_v49  ;;  %v944_v57 = vmul.f32 %v928_v4, %v896_v51  ;;  %v945_v12 = vmul.f32 %v929_v16, %v903_v33 }
 0x3f7   : > { %v946_v3 = vmul.f32 %v930_v54, %v910_v52  ;;  %v947_v15 = vmul.f32 %v931_v55, %v917_v63  ;;  %v948_v9 = vmul.f32 %v932_v35, %v924_v2 }
 0x3f8   : > { %v957_v8 = vrot.slane %v942_v53, 7  ;;  %v959_v11 = vrot.slane %v943_v61, 6  ;;  %v961_v17 = vrot.slane %v944_v57, 5  ;;  %v963_v28 = vrot.slane %v945_v12, 4 }
 0x3f9   : > { %v965_v19 = vrot.slane %v946_v3, 3  ;;  %v967_v37 = vrot.slane %v947_v15, 2  ;;  %v969_v22 = vrot.slane %v948_v9, 1 }
 0x3fa   : > { %v958_v26 = vsel %vm580_vm1, %v957_v8, %v941_v14 }
 0x3fb   : > { %v960_v18 = vsel %vm582_vm2, %v959_v11, %v958_v26 }
 0x3fc   : > { %v962_v30 = vsel %vm584_vm3, %v961_v17, %v960_v18 }
 0x3fd   : > { %v964_v39 = vsel %vm586_vm4, %v963_v28, %v962_v30 }
 0x3fe   : > { %v966_v7 = vsel %vm588_vm5, %v965_v19, %v964_v39 }
 0x3ff   : > { %v968_v34 = vsel %vm590_vm6, %v967_v37, %v966_v7 }
 0x400   : > { %v970_v50 = vsel %vm592_vm7, %v969_v22, %v968_v34 }
 0x401   : > { %972 = vst [vmem:[%s231_s29] sm:$0xff] %v970_v50 }
 0x402   : > { %1422 = shalt.err (!%p1419_p7)
}
 0x403   : > { %s1423_s11 = scalar_lea.hbm %s1972_s8, 128  ;;  %s1427_s23 = scalar_lea.hbm %s2021_s4, 256 }
 0x404   : > { %p1424_p9 = scmp.ne.s32.totalorder %s1972_s8, %s1423_s11  ;;  %p1428_p5 = scmp.lt.u32.totalorder %s1972_s8, %s2021_s4 }
 0x405   : > { %p1429_p11 = scmp.lt.u32.totalorder %s1427_s23, %s1423_s11  ;;  %p1431_p4 = scmp.lt.u32.totalorder %s1423_s11, %s1972_s8 }
 0x406   : > { %p1425_p1 = pnand %p1424_p9, %p1606_p12 }
 0x407   : > { %p1430_p2 = por %p1429_p11, %p1428_p5 }
 0x408   : > { %p1426_p0 = pneg %p1425_p1 }
 0x409   : > { %p1432_p6 = por %p1431_p4, %p1430_p2 }
 0x40b   : > { %p1433_p8 = pnand %p1432_p6, %p1426_p0 }
 0x40d   : > { %1436 = shalt.err (!%p1433_p8)
}
 0x40e   : > { %1229 = dma.vmem_to_hbm [thread:$0]  (%p1606_p12), %s1974_s10, 128, %s1972_s8, %s974_s19  }
 0x40f PF: > { %s999_s9 = sand.u32 1, %s1467_s15   ;;  %p2036_p10 = scmp.ne.s32.totalorder %s2026_s22, 0 }
 0x410   : > { %p2037_p13 = scmp.ge.s32.totalorder %s1479_s18, 2  ;;  %s1000_s28 = scalar_lea.sflag [#allocation4], %s999_s9 }
 0x412   : > { %p1240_p3 = pnand %p2037_p13, %p2036_p10 }
 0x414   : > { %1462 = dma.done.wait (!%p1240_p3), %s1000_s28, 128  }
 0x415   : > { %1464 = vsyncadd (!%p1240_p3), %s1000_s28, 4294967168  ;;  %p18_p7 = scmp.ge.s32.totalorder %s1568_s27, 4   ;;  %s2038_s15 = smov %s1471_s16 }
 0x416   : > { %s2039_s16 = smov %s1475_s17  ;;  %s2040_s17 = smov %s1602_s24 }
 0x417   : > { %s2041_s18 = smov %s1568_s27  ;;  %20 = sbr.rel (!%p18_p7) target bundleno = 6 (0x6), region = 85 }
 0x41e   :  { %1005 = vsyncpa [#allocation3], 1 }
 0x41f   :  { %1007 = vsyncpa [#allocation3 + $0x1], 1 }
 0x420   :  { %1008 = vsyncpa [#allocation6], 1 }
 0x421   :  { %1009 = vsyncpa [#allocation4], 1 }
 0x422   :  { %1011 = vsyncpa [#allocation4 + $0x1], 1 }

</bundles_post_ra>
